<compile_context>
chip_gen: v7x
topology: tpu7x:2x2x1
jax: 0.10.0
libtpu: 0.0.40
codegen_flags: <defaults>
</compile_context>

<pallas_src>
import functools

import jax
import jax.numpy as jnp
import numpy as np
from jax import lax
from jax.experimental import pallas as pl
from jax.experimental.pallas import tpu as pltpu


# --------------------------------------------------------------------------
# Pallas kernel: trilinear grid_sample on one (batch, Q-tile) block
# --------------------------------------------------------------------------
def _make_st_kernel(D, H, W, C, grid_batched, compute_dtype, precision):
    HW = H * W

    def kernel(grid_ref, flow_ref, src_ref, out_ref):
        # Voxel-space sample locations for this Q tile.  (normalize +
        # align_corners=True un-normalize is the identity.)
        g = grid_ref[0] if grid_batched else grid_ref[...]            # (3, TQ)
        loc = g.astype(jnp.float32) + flow_ref[0].astype(jnp.float32)
        TQ = loc.shape[-1]

        def axis_w(i, S):
            # Tent weights: w[s, p] = max(0, 1 - |s - pos_p|).  Encodes both
            # trilinear corners and zeros padding (OOB corners contribute 0).
            pos = loc[i:i + 1, :]                                     # (1, TQ)
            s = lax.broadcasted_iota(jnp.int32, (S, TQ), 0).astype(jnp.float32)
            return jnp.maximum(0.0, 1.0 - jnp.abs(s - pos))           # (S, TQ)

        wz = axis_w(0, D)                                             # (D, TQ)
        wy = axis_w(1, H)                                             # (H, TQ)
        wx = axis_w(2, W)                                             # (W, TQ)

        # In-plane (y, x) weights: Wyx[h*W + w, p] = wy[h, p] * wx[w, p].
        wyx = (wy[:, None, :] * wx[None, :, :]).reshape(HW, TQ)

        # One MXU contraction over the in-plane axis for all (c, d) rows.
        planes = jnp.dot(src_ref[0], wyx.astype(compute_dtype),
                         precision=precision,
                         preferred_element_type=jnp.float32)          # (C*D, TQ)

        # Blend the D z-planes (tiny VPU work; rows are c-major, d-minor).
        planes = planes.reshape(C, D, TQ)
        out = jnp.sum(planes * wz[None, :, :], axis=1)                # (C, TQ)
        out_ref[0] = out.astype(out_ref.dtype)

    return kernel


# --------------------------------------------------------------------------
# Wrapper
# --------------------------------------------------------------------------
def spatial_transformer(src, flow, grid, mode="bilinear", *,
                        high_precision=False):
    """3-D SpatialTransformer (trilinear, align_corners=True, zeros padding).

    src:  (B, C, D, H, W)
    flow: (B, 3, D, H, W)  channel i displaces along spatial dim i (D, H, W)
    grid: (3, D, H, W) or (B, 3, D, H, W) sampling grid (identity in morphmap)
    """
    if mode != "bilinear":
        # TODO(synk): mode='nearest' and the 2-D branch of the PyTorch module
        # are not implemented; MPTUNETR/morphmap uses the 3-D bilinear path.
        raise NotImplementedError("only mode='bilinear' (trilinear) supported")

    B, C, D, H, W = src.shape
    Q = D * H * W
    HW = H * W
    CD = C * D

    compute_dtype = jnp.float32 if high_precision else jnp.bfloat16
    op_bytes = 4 if high_precision else 2
    precision = lax.Precision.HIGHEST if high_precision else None

    # ---- Q-tile size: multiple of 128, bounded by a conservative VMEM budget
    # (fits v5e's 16 MiB default scoped and v7x's 64 MiB physical with room
    # for double-buffered I/O blocks).
    def rup(x, m):
        return -(-x // m) * m

    budget = 8 << 20  # bytes for the dominant per-tile temporaries
    per_col = (HW * (4 + op_bytes)   # f32 wy*wx product + casted Wyx
               + CD * 8              # f32 planes (+ slack)
               + (D + H + W) * 4     # per-axis weights
               + C * 8 + 3 * 8)      # out tile + coordinate rows
    tq_cap = max(128, (budget // per_col) // 128 * 128)
    TQ = int(min(rup(Q, 128), tq_cap, 2048))
    Qp = int(rup(Q, TQ))
    n_q = Qp // TQ
    pad_q = Qp - Q

    # ---- Flatten / pad inputs.  Padded columns sample location 0 and are
    # sliced off the output; harmless.
    grid_batched = (grid.ndim == 5)
    if grid_batched:
        grid_flat = jnp.pad(grid.reshape(B, 3, Q).astype(jnp.float32),
                            ((0, 0), (0, 0), (0, pad_q)))
        grid_in_spec = pl.BlockSpec((1, 3, TQ), lambda b, q: (b, 0, q))
    else:
        # Shared identity grid: DMA'd once per tile, never materialized per-batch.
        grid_flat = jnp.pad(grid.reshape(3, Q).astype(jnp.float32),
                            ((0, 0), (0, pad_q)))
        grid_in_spec = pl.BlockSpec((3, TQ), lambda b, q: (0, q))

    flow_flat = jnp.pad(flow.reshape(B, 3, Q).astype(jnp.float32),
                        ((0, 0), (0, 0), (0, pad_q)))
    # Rows ordered (c major, d minor): the in-kernel (C*D, TQ) -> (C, D, TQ)
    # split leaves the lane (TQ) dimension untouched.
    src_rows = src.reshape(B, CD, HW).astype(compute_dtype)

    kernel = _make_st_kernel(D, H, W, C, grid_batched, compute_dtype, precision)
    out_flat = pl.pallas_call(
        kernel,
        out_shape=jax.ShapeDtypeStruct((B, C, Qp), src.dtype),
        grid_spec=pltpu.PrefetchScalarGridSpec(
            num_scalar_prefetch=0,
            grid=(B, n_q),
            in_specs=[
                grid_in_spec,                                          # grid
                pl.BlockSpec((1, 3, TQ), lambda b, q: (b, 0, q)),      # flow
                pl.BlockSpec((1, CD, HW), lambda b, q: (b, 0, 0)),     # src
            ],
            out_specs=pl.BlockSpec((1, C, TQ), lambda b, q: (b, 0, q)),
        ),
        # Batch elements are independent (megacore-shardable on v7x); the q
        # axis is "arbitrary" so the src block stays VMEM-resident across it.
        compiler_params=pltpu.CompilerParams(
            dimension_semantics=("parallel", "arbitrary")),
    )(grid_flat, flow_flat, src_rows)

    return out_flat[:, :, :Q].reshape(B, C, D, H, W)


# --------------------------------------------------------------------------
# Pure-JAX gather-based reference (independent of Pallas), faithful to torch
# --------------------------------------------------------------------------
def reference_forward(src, flow, grid, mode="bilinear"):
    assert mode == "bilinear"
    B, C, D, H, W = src.shape
    dims = (D, H, W)
    Q = D * H * W
    new_locs = (jnp.broadcast_to(grid, flow.shape).astype(jnp.float32)
                + flow.astype(jnp.float32))
    coords = []
    for i, S in enumerate(dims):
        n = 2.0 * (new_locs[:, i] / float(S - 1) - 0.5)      # torch normalize
        coords.append(((n + 1.0) * float(S - 1) * 0.5).reshape(B, Q))
    z, y, x = coords
    z0, y0, x0 = jnp.floor(z), jnp.floor(y), jnp.floor(x)
    fz, fy, fx = z - z0, y - y0, x - x0
    z0i, y0i, x0i = (z0.astype(jnp.int32), y0.astype(jnp.int32),
                     x0.astype(jnp.int32))

    src_flat = src.reshape(B, C, Q).astype(jnp.float32)
    out = jnp.zeros((B, C, Q), jnp.float32)
    for cz in (0, 1):
        zi = z0i + cz
        wz = fz if cz else 1.0 - fz
        vz = (zi >= 0) & (zi < D)
        for cy in (0, 1):
            yi = y0i + cy
            wy = fy if cy else 1.0 - fy
            vy = (yi >= 0) & (yi < H)
            for cx in (0, 1):
                xi = x0i + cx
                wx = fx if cx else 1.0 - fx
                vx = (xi >= 0) & (xi < W)
                wgt = jnp.where(vz & vy & vx, wz * wy * wx, 0.0)   # (B, Q)
                idx = (jnp.clip(zi, 0, D - 1) * (H * W)
                       + jnp.clip(yi, 0, H - 1) * W
                       + jnp.clip(xi, 0, W - 1))
                g = jnp.take_along_axis(
                    src_flat,
                    jnp.broadcast_to(idx[:, None, :], (B, C, Q)), axis=2)
                out = out + wgt[:, None, :] * g
    return out.reshape(B, C, D, H, W)


if __name__ == "__main__":
    B, C, D, H, W = 2, 4, 8, 8, 8

    key = jax.random.PRNGKey(0)
    k1, k2 = jax.random.split(key, 2)
    src = jax.random.normal(k1, (B, C, D, H, W), jnp.float32)
    # A few-voxel random deformation; some samples land outside the volume so
    # the zeros-padding path is exercised as well.
    flow = 1.5 * jax.random.normal(k2, (B, 3, D, H, W), jnp.float32)
    zz, yy, xx = jnp.meshgrid(jnp.arange(D), jnp.arange(H), jnp.arange(W),
                              indexing="ij")
    grid = jnp.stack([zz, yy, xx]).astype(jnp.float32)        # (3, D, H, W)

    fwd = jax.jit(functools.partial(spatial_transformer))
    out = jax.block_until_ready(fwd(src, flow, grid))
    assert out.shape == (B, C, D, H, W)

    ref = jax.block_until_ready(reference_forward(src, flow, grid))
    # Everything except the single MXU contraction is exact f32.  Operands of
    # the dot are bf16 (what default MXU precision uses anyway); error bound
    # ~2^-8 * max|src| ~= 1.6e-2.  Use high_precision=True for exact-f32 dots.
    np.testing.assert_allclose(np.asarray(out), np.asarray(ref),
                               atol=2e-2, rtol=2e-2)

    print("KERNEL_OK")
</pallas_src>

<mosaic_0001>
module attributes {stable_mosaic.version = 11 : i64} {
  func.func @kernel(%arg0: i32, %arg1: i32, %arg2: memref<3x512xf32, #tpu.memory_space<vmem>>, %arg3: memref<1x3x512xf32, #tpu.memory_space<vmem>>, %arg4: memref<1x32x64xbf16, #tpu.memory_space<vmem>>, %arg5: memref<1x4x512xf32, #tpu.memory_space<vmem>>) attributes {dimension_semantics = [#tpu.dimension_semantics<parallel>, #tpu.dimension_semantics<arbitrary>], iteration_bounds = array<i64: 2, 1>, scalar_prefetch = 0 : i64, scratch_operands = 0 : i64, tpu.core_type = #tpu.core_type<tc>, window_params = [{transform_indices = @transform_0, window_bounds = array<i64: 3, 512>}, {transform_indices = @transform_1, window_bounds = array<i64: 1, 3, 512>}, {transform_indices = @transform_2, window_bounds = array<i64: 1, 32, 64>}, {transform_indices = @transform_3, window_bounds = array<i64: 1, 4, 512>}]} {
    %c0 = arith.constant 0 : index
    %c0_0 = arith.constant 0 : index
    %0 = vector.load %arg2[%c0, %c0_0] : memref<3x512xf32, #tpu.memory_space<vmem>>, vector<3x512xf32>
    %c0_1 = arith.constant 0 : index
    %c0_2 = arith.constant 0 : index
    %c0_3 = arith.constant 0 : index
    %1 = vector.load %arg3[%c0_1, %c0_2, %c0_3] : memref<1x3x512xf32, #tpu.memory_space<vmem>>, vector<1x3x512xf32>
    %2 = vector.shape_cast %1 : vector<1x3x512xf32> to vector<3x512xf32>
    %3 = arith.addf %0, %2 : vector<3x512xf32>
    %4 = vector.extract_strided_slice %3 {offsets = [0, 0], sizes = [1, 512], strides = [1, 1]} : vector<3x512xf32> to vector<1x512xf32>
    %5 = tpu.iota {dimensions = array<i32: 0>} : vector<8x512xi32>
    %6 = arith.sitofp %5 : vector<8x512xi32> to vector<8x512xf32>
    %7 = vector.broadcast %4 : vector<1x512xf32> to vector<8x512xf32>
    %8 = arith.subf %6, %7 : vector<8x512xf32>
    %9 = math.absf %8 : vector<8x512xf32>
    %cst = arith.constant 1.000000e+00 : f32
    %10 = vector.broadcast %cst : f32 to vector<8x512xf32>
    %11 = arith.subf %10, %9 : vector<8x512xf32>
    %cst_4 = arith.constant 0.000000e+00 : f32
    %12 = vector.broadcast %cst_4 : f32 to vector<8x512xf32>
    %13 = arith.maximumf %12, %11 : vector<8x512xf32>
    %14 = vector.extract_strided_slice %3 {offsets = [1, 0], sizes = [1, 512], strides = [1, 1]} : vector<3x512xf32> to vector<1x512xf32>
    %15 = tpu.iota {dimensions = array<i32: 0>} : vector<8x512xi32>
    %16 = arith.sitofp %15 : vector<8x512xi32> to vector<8x512xf32>
    %17 = vector.broadcast %14 : vector<1x512xf32> to vector<8x512xf32>
    %18 = arith.subf %16, %17 : vector<8x512xf32>
    %19 = math.absf %18 : vector<8x512xf32>
    %cst_5 = arith.constant 1.000000e+00 : f32
    %20 = vector.broadcast %cst_5 : f32 to vector<8x512xf32>
    %21 = arith.subf %20, %19 : vector<8x512xf32>
    %cst_6 = arith.constant 0.000000e+00 : f32
    %22 = vector.broadcast %cst_6 : f32 to vector<8x512xf32>
    %23 = arith.maximumf %22, %21 : vector<8x512xf32>
    %24 = vector.extract_strided_slice %3 {offsets = [2, 0], sizes = [1, 512], strides = [1, 1]} : vector<3x512xf32> to vector<1x512xf32>
    %25 = tpu.iota {dimensions = array<i32: 0>} : vector<8x512xi32>
    %26 = arith.sitofp %25 : vector<8x512xi32> to vector<8x512xf32>
    %27 = vector.broadcast %24 : vector<1x512xf32> to vector<8x512xf32>
    %28 = arith.subf %26, %27 : vector<8x512xf32>
    %29 = math.absf %28 : vector<8x512xf32>
    %cst_7 = arith.constant 1.000000e+00 : f32
    %30 = vector.broadcast %cst_7 : f32 to vector<8x512xf32>
    %31 = arith.subf %30, %29 : vector<8x512xf32>
    %cst_8 = arith.constant 0.000000e+00 : f32
    %32 = vector.broadcast %cst_8 : f32 to vector<8x512xf32>
    %33 = arith.maximumf %32, %31 : vector<8x512xf32>
    %34 = vector.shape_cast %23 : vector<8x512xf32> to vector<8x1x512xf32>
    %35 = vector.shape_cast %33 : vector<8x512xf32> to vector<1x8x512xf32>
    %36 = vector.broadcast %34 : vector<8x1x512xf32> to vector<8x8x512xf32>
    %37 = vector.broadcast %35 : vector<1x8x512xf32> to vector<8x8x512xf32>
    %38 = arith.mulf %36, %37 : vector<8x8x512xf32>
    %39 = vector.shape_cast %38 : vector<8x8x512xf32> to vector<64x512xf32>
    %c0_9 = arith.constant 0 : index
    %c0_10 = arith.constant 0 : index
    %c0_11 = arith.constant 0 : index
    %40 = vector.load %arg4[%c0_9, %c0_10, %c0_11] : memref<1x32x64xbf16, #tpu.memory_space<vmem>>, vector<1x32x64xbf16>
    %41 = vector.shape_cast %40 : vector<1x32x64xbf16> to vector<32x64xbf16>
    %42 = arith.truncf %39 : vector<64x512xf32> to vector<64x512xbf16>
    %cst_12 = arith.constant dense<0.000000e+00> : vector<32x512xf32>
    %43 = tpu.matmul %41, %42, %cst_12 {dimension_numbers = #tpu.dot_dimension_numbers<[1], [0], [0], [1], [0, 0, 1, 1], [], []>} : vector<32x64xbf16>, vector<64x512xbf16>, vector<32x512xf32> -> vector<32x512xf32>
    %44 = vector.shape_cast %43 : vector<32x512xf32> to vector<4x8x512xf32>
    %45 = vector.shape_cast %13 : vector<8x512xf32> to vector<1x8x512xf32>
    %46 = vector.broadcast %45 : vector<1x8x512xf32> to vector<4x8x512xf32>
    %47 = arith.mulf %44, %46 : vector<4x8x512xf32>
    %cst_13 = arith.constant dense<0.000000e+00> : vector<4x512xf32>
    %48 = vector.multi_reduction <add>, %47, %cst_13 [1] : vector<4x8x512xf32> to vector<4x512xf32>
    %c0_14 = arith.constant 0 : index
    %c0_15 = arith.constant 0 : index
    %c0_16 = arith.constant 0 : index
    %49 = vector.load %arg5[%c0_14, %c0_15, %c0_16] : memref<1x4x512xf32, #tpu.memory_space<vmem>>, vector<1x4x512xf32>
    %50 = vector.shape_cast %49 : vector<1x4x512xf32> to vector<4x512xf32>
    %51 = vector.shape_cast %48 : vector<4x512xf32> to vector<1x4x512xf32>
    tpu.vector_store %arg5[%c0_14, %c0_15, %c0_16], %51 {strides = array<i32>} : memref<1x4x512xf32, #tpu.memory_space<vmem>>, vector<1x4x512xf32>,
    return
  }
  func.func @transform_0(%arg0: i32, %arg1: i32) -> (i32, i32) {
    %c0_i32 = arith.constant 0 : i32
    %c0_i32_0 = arith.constant 0 : i32
    return %c0_i32, %arg1 : i32, i32
  }
  func.func @transform_1(%arg0: i32, %arg1: i32) -> (i32, i32, i32) {
    %c0_i32 = arith.constant 0 : i32
    %c0_i32_0 = arith.constant 0 : i32
    return %arg0, %c0_i32, %arg1 : i32, i32, i32
  }
  func.func @transform_2(%arg0: i32, %arg1: i32) -> (i32, i32, i32) {
    %c0_i32 = arith.constant 0 : i32
    %c0_i32_0 = arith.constant 0 : i32
    %c0_i32_1 = arith.constant 0 : i32
    return %arg0, %c0_i32, %c0_i32_0 : i32, i32, i32
  }
  func.func @transform_3(%arg0: i32, %arg1: i32) -> (i32, i32, i32) {
    %c0_i32 = arith.constant 0 : i32
    %c0_i32_0 = arith.constant 0 : i32
    return %arg0, %c0_i32, %arg1 : i32, i32, i32
  }
}

</mosaic_0001>

<bundles_post_ra>
// kernel: spatial_transformer.1
= control target key start
LH: loop header
LB: loop body
LE: loop exit
PB: predicated region body
PF: predicated region fallthrough
CT: control target
= control target key end

     0   :  { %s1202_s12 = smov 0   ;;  %s1204_s13 = smov 0   ;;  %s1443_s0 = inlined_call_operand.vmem [shape: f32[3,512], index: 0, kind: input, shape index: {}]   ;;  %s1444_s1 = inlined_call_operand.vmem [shape: f32[2,3,512], index: 1, kind: input, shape index: {}]   ;;  %s1445_s2 = inlined_call_operand.vmem [shape: bf16[2,32,64], index: 2, kind: input, shape index: {}]   ;;  %s1446_s3 = inlined_call_operand.vmem [shape: f32[2,4,512], index: 3, kind: output, shape index: {}]  }
   0x1   :  { %s1206_s14 = smov 0  }
   0x2 LB: > { %s25_s15 = sadd.s32 1, %s1174_s13  ;;  %p1110_p0 = scmp.ge.s32.totalorder %s1178_s14, 1  ;;  %s1178_s14 = sphi %s1206_s14, %s13_s14   ;;  %s1174_s13 = sphi %s1204_s13, %s1448_s13   ;;  %s1170_s12 = sphi %s1202_s12, %s1447_s12  }
   0x3   : > { %p27_p1 = scmp.ge.s32.totalorder %s25_s15, 2  ;;  %p179_p2 = scmp.lt.s32.totalorder %s1178_s14, 3 }
   0x5   : > { %s1450_s15 = smov (%p27_p1, %s25_s15), 0  ;;  %p180_p3 = pnand %p1110_p0, %p179_p2 }
   0x6   : > { %p228_p4 = scmp.lt.s32.totalorder (!%p180_p3), %s1170_s12, 1  ;;  %v259_v0 = vlaneseq (!%p180_p3)  ;;  %v1180_v1 = vmov (!%p180_p3), 0   ;;  %v253_v3 = vld [vmem:[%s1443_s0] sm:$0x77] (!%p180_p3)  ;;  %v254_v4 = vld [vmem:[%s1443_s0 + $0x8] sm:$0x77] (!%p180_p3) }
   0x7   : > { %183 = sbr.rel (%p180_p3) target bundleno = 327 (0x147), region = 32  ;;  %753 = vmatprep.mubr.bf16.mxu0 (!%p180_p3), %v1180_v1  ;;  %806 = vmatprep.mubr.bf16.mxu1 (!%p180_p3), %v1180_v1  ;;  %v1181_v14 = vmov (!%p180_p3), 1966171168   ;;  %vm714_vm0 = vcmask (!%p180_p3), 523264   ;;  %vm964_vm1 = vcmask (!%p180_p3), 1041409   ;;  %vm966_vm2 = vcmask (!%p180_p3), 1045509  }
   0x8   : > { %v1222_v2 = vshrl.u32 (!%p180_p3), %v259_v0, 7  ;;  %v429_v15 = vunpack.c.l.s4 (!%p180_p3), %v1181_v14  ;;  %vm969_vm3 = vcmask (!%p180_p3), 1042434   ;;  %vm971_vm4 = vcmask (!%p180_p3), 1046534  }
   0x9   : > { %vm974_vm5 = vcmask (!%p180_p3), 1043459   ;;  %vm976_vm6 = vcmask (!%p180_p3), 1047559  }
   0xa   : > { %v1237_v5 = vsub.s32 (!%p180_p3), 1, %v1222_v2  ;;  %v322_v6 = vsub.s32 (!%p180_p3), 5, %v1222_v2  ;;  %v1241_v7 = vsub.s32 (!%p180_p3), 2, %v1222_v2  ;;  %v374_v8 = vsub.s32 (!%p180_p3), 6, %v1222_v2 }
   0xb   : > { %v1255_v13 = vcvt.s32.f32 (!%p180_p3), %v1222_v2  ;;  %v430_v39 = vunpack.c.0.s8 (!%p180_p3), %v429_v15 }
   0xd   : > { %v433_v52 = vsub.s32 (!%p180_p3), %v430_v39, %v1222_v2 }
   0xe   : > { %s1452_s12 = smov (!%p228_p4, %s1170_s12), 1 }
   0xf   : > { %s1227_s18 = sshll.u32 %s1452_s12, 4 }
  0x10   : > { %s235_s23 = scalar_lea.vmem %s1444_s1, %s1227_s18  ;;  %s1248_s26 = scalar_lea.vmem %s1445_s2, %s1227_s18 }
  0x11   : > { %v255_v9 = vld [vmem:[%s235_s23] sm:$0x77]  ;;  %v256_v10 = vld [vmem:[%s235_s23 + $0x8] sm:$0x77]  ;;  %s250_s29 = scalar_lea.vmem %s1446_s3, %s1227_s18 }
  0x12   : > { %v1250_v11 = vadd.f32 %v255_v9, %v253_v3  ;;  %v1252_v12 = vadd.f32 %v256_v10, %v254_v4 }
  0x14   : > { %v319_v16 = vrot.slane %v1250_v11, %v1237_v5  ;;  %v323_v17 = vrot.slane %v1250_v11, %v322_v6  ;;  %v327_v18 = vrot.slane %v1252_v12, %v1237_v5  ;;  %v331_v19 = vrot.slane %v1252_v12, %v322_v6 }
  0x15   : > { %v375_v20 = vrot.slane %v1250_v11, %v374_v8  ;;  %v383_v21 = vrot.slane %v1252_v12, %v374_v8  ;;  %v371_v22 = vrot.slane %v1250_v11, %v1241_v7  ;;  %v379_v23 = vrot.slane %v1252_v12, %v1241_v7 }
  0x16   : > { %v339_v24 = vrot.slane %v319_v16, %v1237_v5  ;;  %v343_v25 = vrot.slane %v323_v17, %v1237_v5  ;;  %v347_v26 = vrot.slane %v327_v18, %v1237_v5  ;;  %v351_v27 = vrot.slane %v331_v19, %v1237_v5 }
  0x17   : > { %v395_v28 = vrot.slane %v375_v20, %v1241_v7  ;;  %v403_v29 = vrot.slane %v383_v21, %v1241_v7  ;;  %v391_v30 = vrot.slane %v371_v22, %v1241_v7  ;;  %v399_v31 = vrot.slane %v379_v23, %v1241_v7 }
  0x18   : > { %v352_v32 = vsub.f32 %v1255_v13, %v339_v24  ;;  %v353_v33 = vsub.f32 %v1255_v13, %v343_v25  ;;  %v354_v34 = vsub.f32 %v1255_v13, %v347_v26  ;;  %v355_v35 = vsub.f32 %v1255_v13, %v351_v27 }
  0x19   : > { %v405_v41 = vsub.f32 %v1255_v13, %v395_v28  ;;  %v407_v42 = vsub.f32 %v1255_v13, %v403_v29  ;;  %v404_v43 = vsub.f32 %v1255_v13, %v391_v30  ;;  %v406_v47 = vsub.f32 %v1255_v13, %v399_v31 }
  0x1a   : > { %v356_v36 = vand.u32 2147483647, %v352_v32  ;;  %v357_v37 = vand.u32 2147483647, %v353_v33  ;;  %v358_v38 = vand.u32 2147483647, %v354_v34 }
  0x1b   : > { %v359_v40 = vand.u32 2147483647, %v355_v35  ;;  %v409_v54 = vand.u32 2147483647, %v405_v41  ;;  %v411_v55 = vand.u32 2147483647, %v407_v42 }
  0x1c   : > { %v360_v44 = vsub.f32 1.0, %v356_v36  ;;  %v361_v45 = vsub.f32 1.0, %v357_v37  ;;  %v362_v46 = vsub.f32 1.0, %v358_v38  ;;  %v408_v57 = vand.u32 2147483647, %v404_v43 }
  0x1d   : > { %v363_v48 = vsub.f32 1.0, %v359_v40  ;;  %v410_v58 = vand.u32 2147483647, %v406_v47  ;;  %v413_v0 = vsub.f32 1.0, %v409_v54  ;;  %v415_v4 = vsub.f32 1.0, %v411_v55 }
  0x1e   : > { %v364_v49 = vmax.f32 %v360_v44, 0.0  ;;  %v365_v50 = vmax.f32 %v361_v45, 0.0  ;;  %v366_v51 = vmax.f32 %v362_v46, 0.0  ;;  %v1287_v8 = vsub.s32 3, %v1222_v2 }
  0x1f   : > { %v367_v53 = vmax.f32 %v363_v48, 0.0  ;;  %v412_v9 = vsub.f32 1.0, %v408_v57  ;;  %v414_v10 = vsub.f32 1.0, %v410_v58  ;;  %v1290_v18 = vsub.s32 0, %v1222_v2 }
  0x20   : > { %v424_v56 = vcombine.low %v364_v49, %v365_v50  ;;  %v425_v59 = vcombine.high %v364_v49, %v365_v50  ;;  %v1292_v19 = vmax.f32 %v413_v0, 0.0  ;;  %v1294_v22 = vmax.f32 %v415_v4, 0.0 }
  0x21   : > { %v426_v60 = vcombine.low %v366_v51, %v367_v53  ;;  %v427_v61 = vcombine.high %v366_v51, %v367_v53  ;;  %v1296_v23 = vmax.f32 %v412_v9, 0.0  ;;  %v1298_v24 = vmax.f32 %v414_v10, 0.0 }
  0x22   : > { %v434_v62 = vrot.slane %v424_v56, %v433_v52  ;;  %v441_v63 = vrot.slane %v425_v59, %v433_v52 }
  0x23   : > { %v448_v3 = vrot.slane %v426_v60, %v433_v52  ;;  %v455_v6 = vrot.slane %v427_v61, %v433_v52 }
  0x25   : > { %v456_v14 = vcombine.low %v434_v62, %v448_v3  ;;  %v457_v15 = vcombine.high %v434_v62, %v448_v3  ;;  %v458_v16 = vcombine.low %v441_v63, %v455_v6  ;;  %v459_v17 = vcombine.high %v441_v63, %v455_v6 }
  0x27   : > { %v466_v20 = vrot.slane %v456_v14, %v433_v52  ;;  %v480_v21 = vrot.slane %v457_v15, %v433_v52  ;;  %v1300_v25 = vrot.slane %v458_v16, %v433_v52  ;;  %v1302_v26 = vrot.slane %v459_v17, %v433_v52 }
  0x29   : > { %v499_v27 = vrot.slane %v466_v20, %v1237_v5  ;;  %v515_v28 = vrot.slane %v480_v21, %v1237_v5  ;;  %v507_v29 = vrot.slane %v466_v20, %v1287_v8  ;;  %v523_v30 = vrot.slane %v480_v21, %v1287_v8 }
  0x2a   : > { %v495_v31 = vrot.slane %v466_v20, %v1290_v18  ;;  %v511_v32 = vrot.slane %v480_v21, %v1290_v18  ;;  %v503_v33 = vrot.slane %v466_v20, %v1241_v7  ;;  %v519_v34 = vrot.slane %v480_v21, %v1241_v7 }
  0x2b   : > { %v653_v35 = vmul.f32 %v499_v27, %v1292_v19  ;;  %v657_v36 = vmul.f32 %v515_v28, %v1292_v19  ;;  %v655_v37 = vmul.f32 %v507_v29, %v1294_v22  ;;  %v659_v38 = vmul.f32 %v523_v30, %v1294_v22 }
  0x2c   : > { %v652_v39 = vmul.f32 %v495_v31, %v1296_v23  ;;  %v656_v40 = vmul.f32 %v511_v32, %v1296_v23  ;;  %v654_v41 = vmul.f32 %v503_v33, %v1298_v24  ;;  %v658_v42 = vmul.f32 %v519_v34, %v1298_v24 }
  0x2d   : > { %v689_v43 = vpack.c.bf16 %v657_v36, %v653_v35  ;;  %v691_v44 = vpack.c.bf16 %v659_v38, %v655_v37  ;;  %v488_v45 = vcombine.high %v466_v20, %v466_v20  ;;  %v490_v46 = vcombine.high %v480_v21, %v480_v21 }
  0x2e   : > { %v688_v47 = vpack.c.bf16 %v656_v40, %v652_v39  ;;  %v690_v48 = vpack.c.bf16 %v658_v42, %v654_v41  ;;  %v563_v49 = vrot.slane %v1300_v25, %v1237_v5  ;;  %v579_v50 = vrot.slane %v1302_v26, %v1237_v5 }
  0x2f   : > { %721 = vmatprep.subr.bf16.mxu0 %v689_v43  ;;  %774 = vmatprep.subr.bf16.mxu1 %v691_v44  ;;  %v531_v51 = vrot.slane %v488_v45, %v1237_v5  ;;  %v547_v52 = vrot.slane %v490_v46, %v1237_v5  ;;  %v539_v53 = vrot.slane %v488_v45, %v1287_v8 }
  0x30   : > { %722 = vmatpush1.bf16.msra.mxu0 %v688_v47  ;;  %775 = vmatpush1.bf16.msra.mxu1 %v690_v48  ;;  %v555_v54 = vrot.slane %v490_v46, %v1287_v8  ;;  %v527_v55 = vrot.slane %v488_v45, %v1290_v18  ;;  %v543_v56 = vrot.slane %v490_v46, %v1290_v18 }
  0x31   : > { %v661_v57 = vmul.f32 %v531_v51, %v1292_v19  ;;  %v665_v58 = vmul.f32 %v547_v52, %v1292_v19  ;;  %v663_v59 = vmul.f32 %v539_v53, %v1294_v22  ;;  %v535_v60 = vrot.slane %v488_v45, %v1241_v7 }
  0x32   : > { %v667_v61 = vmul.f32 %v555_v54, %v1294_v22  ;;  %v660_v62 = vmul.f32 %v527_v55, %v1296_v23  ;;  %v664_v63 = vmul.f32 %v543_v56, %v1296_v23  ;;  %v551_v0 = vrot.slane %v490_v46, %v1241_v7 }
  0x33   : > { %v693_v3 = vpack.c.bf16 %v665_v58, %v661_v57  ;;  %v662_v4 = vmul.f32 %v535_v60, %v1298_v24  ;;  %v669_v6 = vmul.f32 %v563_v49, %v1292_v19  ;;  %v673_v9 = vmul.f32 %v579_v50, %v1292_v19 }
  0x34   : > { %v695_v10 = vpack.c.bf16 %v667_v61, %v663_v59  ;;  %v692_v14 = vpack.c.bf16 %v664_v63, %v660_v62  ;;  %v666_v15 = vmul.f32 %v551_v0, %v1298_v24  ;;  %v571_v16 = vrot.slane %v1300_v25, %v1287_v8 }
  0x35   : > { %723 = vmatprep.subr.bf16.mxu0 %v693_v3  ;;  %v697_v17 = vpack.c.bf16 %v673_v9, %v669_v6  ;;  %v587_v20 = vrot.slane %v1302_v26, %v1287_v8  ;;  %v559_v21 = vrot.slane %v1300_v25, %v1290_v18  ;;  %v575_v27 = vrot.slane %v1302_v26, %v1290_v18 }
  0x36   : > { %776 = vmatprep.subr.bf16.mxu1 %v695_v10  ;;  %724 = vmatpush1.bf16.msra.mxu0 %v692_v14  ;;  %v694_v28 = vpack.c.bf16 %v666_v15, %v662_v4  ;;  %v671_v29 = vmul.f32 %v571_v16, %v1294_v22  ;;  %v567_v30 = vrot.slane %v1300_v25, %v1241_v7 }
  0x37   : > { %725 = vmatprep.subr.bf16.mxu0 %v697_v17  ;;  %v675_v31 = vmul.f32 %v587_v20, %v1294_v22  ;;  %v668_v32 = vmul.f32 %v559_v21, %v1296_v23  ;;  %v672_v33 = vmul.f32 %v575_v27, %v1296_v23  ;;  %v583_v34 = vrot.slane %v1302_v26, %v1241_v7 }
  0x38   : > { %777 = vmatpush1.bf16.msra.mxu1 %v694_v28  ;;  %v670_v35 = vmul.f32 %v567_v30, %v1298_v24  ;;  %v489_v36 = vcombine.high %v1300_v25, %v1300_v25  ;;  %v491_v37 = vcombine.high %v1302_v26, %v1302_v26  ;;  %v275_v58 = vrot.slane %v1252_v12, %v1290_v18 }
  0x39   : > { %v699_v38 = vpack.c.bf16 %v675_v31, %v671_v29  ;;  %v696_v39 = vpack.c.bf16 %v672_v33, %v668_v32  ;;  %v674_v40 = vmul.f32 %v583_v34, %v1298_v24 }
  0x3a   : > { %v595_v41 = vrot.slane %v489_v36, %v1237_v5  ;;  %v611_v42 = vrot.slane %v491_v37, %v1237_v5  ;;  %v603_v43 = vrot.slane %v489_v36, %v1287_v8  ;;  %v619_v44 = vrot.slane %v491_v37, %v1287_v8 }
  0x3b   : > { %778 = vmatprep.subr.bf16.mxu1 %v699_v38  ;;  %726 = vmatpush1.bf16.msra.mxu0 %v696_v39  ;;  %v698_v45 = vpack.c.bf16 %v674_v40, %v670_v35  ;;  %v591_v25 = vrot.slane %v489_v36, %v1290_v18  ;;  %v607_v46 = vrot.slane %v491_v37, %v1290_v18 }
  0x3c   : > { %v677_v26 = vmul.f32 %v595_v41, %v1292_v19  ;;  %v681_v47 = vmul.f32 %v611_v42, %v1292_v19  ;;  %v679_v48 = vmul.f32 %v603_v43, %v1294_v22  ;;  %v683_v5 = vmul.f32 %v619_v44, %v1294_v22  ;;  %v1154_v22 = vld [vmem:[%s1248_s26] sm:$0xff]  }
  0x3d   : > { %779 = vmatpush1.bf16.msra.mxu1 %v698_v45  ;;  %v676_v49 = vmul.f32 %v591_v25, %v1296_v23  ;;  %v680_v8 = vmul.f32 %v607_v46, %v1296_v23  ;;  %v599_v50 = vrot.slane %v489_v36, %v1241_v7  ;;  %v615_v51 = vrot.slane %v491_v37, %v1241_v7  ;;  %v1155_v7 = vld [vmem:[%s1248_s26 + $0x8] sm:$0xff]  }
  0x3e   : > { %v701_v52 = vpack.c.bf16 %v681_v47, %v677_v26  ;;  %v703_v53 = vpack.c.bf16 %v683_v5, %v679_v48  ;;  %v270_v23 = vsub.s32 4, %v1222_v2 }
  0x3f   : > { %v700_v54 = vpack.c.bf16 %v680_v8, %v676_v49  ;;  %v678_v55 = vmul.f32 %v599_v50, %v1298_v24  ;;  %v682_v19 = vmul.f32 %v615_v51, %v1298_v24  ;;  %v267_v24 = vrot.slane %v1250_v11, %v1290_v18 }
  0x40   : > { %727 = vmatprep.subr.bf16.mxu0 %v701_v52  ;;  %780 = vmatprep.subr.bf16.mxu1 %v703_v53  ;;  %v271_v57 = vrot.slane %v1250_v11, %v270_v23  ;;  %v279_v59 = vrot.slane %v1252_v12, %v270_v23 }
  0x41   : > { %728 = vmatpush1.bf16.msra.mxu0 %v700_v54  ;;  %v702_v56 = vpack.c.bf16 %v682_v19, %v678_v55  ;;  %v287_v60 = vrot.slane %v267_v24, %v1290_v18 }
  0x42   : > { %v291_v61 = vrot.slane %v271_v57, %v1290_v18  ;;  %v299_v62 = vrot.slane %v279_v59, %v1290_v18 }
  0x43   : > { %781 = vmatpush1.bf16.msra.mxu1 %v702_v56  ;;  %v300_v2 = vsub.f32 %v1255_v13, %v287_v60 }
  0x44   : > { %1119 = vmatmul.mubr.msk.bf16.vlgmr.msra.gmra.mrb[0].mxu0 %vm714_vm0, %v1154_v22  ;;  %v301_v63 = vsub.f32 %v1255_v13, %v291_v61  ;;  %v303_v11 = vsub.f32 %v1255_v13, %v299_v62 }
  0x45   : > { %763 = vmatprep.mubr.bf16.mxu0 %v1180_v1  ;;  %v304_v3 = vand.u32 2147483647, %v300_v2 }
  0x46   : > { %1121 = vmatmul.mubr.msk.bf16.vlgmr.msra.gmra.mrb[0].mxu1 %vm714_vm0, %v1154_v22  ;;  %v305_v4 = vand.u32 2147483647, %v301_v63  ;;  %v307_v12 = vand.u32 2147483647, %v303_v11 }
  0x47   : > { %816 = vmatprep.mubr.bf16.mxu1 %v1180_v1  ;;  %v295_v1 = vrot.slane %v275_v58, %v1290_v18  ;;  %v308_v9 = vsub.f32 1.0, %v304_v3 }
  0x48   : > { %v309_v10 = vsub.f32 1.0, %v305_v4  ;;  %v311_v15 = vsub.f32 1.0, %v307_v12 }
  0x49   : > { %v302_v0 = vsub.f32 %v1255_v13, %v295_v1  ;;  %v1399_v16 = vmax.f32 %v308_v9, 0.0 }
  0x4a   : > { %v1401_v17 = vmax.f32 %v309_v10, 0.0  ;;  %v1405_v21 = vmax.f32 %v311_v15, 0.0 }
  0x4b   : > { %v306_v6 = vand.u32 2147483647, %v302_v0 }
  0x4c   : > { %1120 = vmatmul.mubr.msk.bf16.gmra.mrb[4].mxu0 %vm714_vm0, %v1155_v7 }
  0x4d   : > { %v310_v14 = vsub.f32 1.0, %v306_v6 }
  0x4e   : > { %1122 = vmatmul.mubr.msk.bf16.gmra.mrb[4].mxu1 %vm714_vm0, %v1155_v7 }
  0x4f   : > { %v1403_v18 = vmax.f32 %v310_v14, 0.0 }
 0x117   : > { %v755_v20 = vpop.f32.mrb[0].mxu0 }
 0x118   : > { %v827_v27 = vmul.f32 %v755_v20, %v1399_v16  ;;  %v757_v13 = vpop.f32.mrb[1].mxu0 }
 0x119   : > { %v808_v28 = vpop.f32.mrb[0].mxu1  ;;  %v828_v29 = vmul.f32 %v757_v13, %v1401_v17  ;;  %v759_v30 = vpop.f32.mrb[2].mxu0 }
 0x11a   : > { %v843_v31 = vrot.slane %v827_v27, 4  ;;  %v829_v32 = vmul.f32 %v808_v28, %v1403_v18  ;;  %v810_v33 = vpop.f32.mrb[1].mxu1  ;;  %v831_v34 = vmul.f32 %v759_v30, %v1399_v16  ;;  %v761_v35 = vpop.f32.mrb[3].mxu0 }
 0x11b   : > { %v849_v36 = vrot.slane %v828_v29, 4  ;;  %v830_v37 = vmul.f32 %v810_v33, %v1405_v21  ;;  %v812_v38 = vpop.f32.mrb[2].mxu1  ;;  %v832_v39 = vmul.f32 %v761_v35, %v1401_v17 }
 0x11c   : > { %v844_v40 = vadd.f32 %v843_v31, %v827_v27  ;;  %v855_v41 = vrot.slane %v829_v32, 4  ;;  %v867_v42 = vrot.slane %v831_v34, 4  ;;  %v833_v43 = vmul.f32 %v812_v38, %v1403_v18  ;;  %v814_v44 = vpop.f32.mrb[3].mxu1 }
 0x11d   : > { %v850_v45 = vadd.f32 %v849_v36, %v828_v29  ;;  %v861_v25 = vrot.slane %v830_v37, 4  ;;  %v873_v46 = vrot.slane %v832_v39, 4  ;;  %v834_v26 = vmul.f32 %v814_v44, %v1405_v21 }
 0x11e   : > { %v845_v47 = vrot.slane %v844_v40, 2  ;;  %v856_v48 = vadd.f32 %v855_v41, %v829_v32  ;;  %v868_v5 = vadd.f32 %v867_v42, %v831_v34  ;;  %v879_v49 = vrot.slane %v833_v43, 4 }
 0x11f   : > { %v851_v8 = vrot.slane %v850_v45, 2  ;;  %v862_v50 = vadd.f32 %v861_v25, %v830_v37  ;;  %v874_v51 = vadd.f32 %v873_v46, %v832_v39  ;;  %v885_v52 = vrot.slane %v834_v26, 4  ;;  %v765_v53 = vpop.f32.mrb[4].mxu0 }
 0x120   : > { %v846_v54 = vadd.f32 %v845_v47, %v844_v40  ;;  %v857_v55 = vrot.slane %v856_v48, 2  ;;  %v869_v19 = vrot.slane %v868_v5, 2  ;;  %v880_v22 = vadd.f32 %v879_v49, %v833_v43  ;;  %v767_v56 = vpop.f32.mrb[5].mxu0 }
 0x121   : > { %v852_v7 = vadd.f32 %v851_v8, %v850_v45  ;;  %v863_v23 = vrot.slane %v862_v50, 2  ;;  %v875_v24 = vrot.slane %v874_v51, 2  ;;  %v886_v57 = vadd.f32 %v885_v52, %v834_v26  ;;  %v818_v58 = vpop.f32.mrb[4].mxu1  ;;  %v769_v59 = vpop.f32.mrb[6].mxu0 }
 0x122   : > { %v847_v60 = vrot.slane %v846_v54, 1  ;;  %v858_v61 = vadd.f32 %v857_v55, %v856_v48  ;;  %v870_v1 = vadd.f32 %v869_v19, %v868_v5  ;;  %v881_v62 = vrot.slane %v880_v22, 2  ;;  %v820_v2 = vpop.f32.mrb[5].mxu1  ;;  %v1415_v63 = vpop.f32.mrb[7].mxu0 }
 0x123   : > { %v853_v0 = vrot.slane %v852_v7, 1  ;;  %v864_v11 = vadd.f32 %v863_v23, %v862_v50  ;;  %v876_v3 = vadd.f32 %v875_v24, %v874_v51  ;;  %v887_v4 = vrot.slane %v886_v57, 2  ;;  %v822_v6 = vpop.f32.mrb[6].mxu1 }
 0x124   : > { %v848_v12 = vadd.f32 %v847_v60, %v846_v54  ;;  %v859_v9 = vrot.slane %v858_v61, 1  ;;  %v871_v10 = vrot.slane %v870_v1, 1  ;;  %v882_v14 = vadd.f32 %v881_v62, %v880_v22  ;;  %v824_v15 = vpop.f32.mrb[7].mxu1 }
 0x125   : > { %v854_v20 = vadd.f32 %v853_v0, %v852_v7  ;;  %v865_v27 = vrot.slane %v864_v11, 1  ;;  %v877_v13 = vrot.slane %v876_v3, 1  ;;  %v888_v28 = vadd.f32 %v887_v4, %v886_v57 }
 0x126   : > { %v860_v29 = vadd.f32 %v859_v9, %v858_v61  ;;  %v872_v30 = vadd.f32 %v871_v10, %v870_v1  ;;  %v883_v31 = vrot.slane %v882_v14, 1  ;;  %v835_v32 = vmul.f32 %v765_v53, %v1399_v16 }
 0x127   : > { %v955_v33 = vcombine.low %v848_v12, %v854_v20  ;;  %v866_v34 = vadd.f32 %v865_v27, %v864_v11  ;;  %v878_v35 = vadd.f32 %v877_v13, %v876_v3  ;;  %v889_v36 = vrot.slane %v888_v28, 1 }
 0x128   : > { %v884_v37 = vadd.f32 %v883_v31, %v882_v14  ;;  %v891_v38 = vrot.slane %v835_v32, 4  ;;  %v837_v39 = vmul.f32 %v818_v58, %v1403_v18  ;;  %v836_v40 = vmul.f32 %v767_v56, %v1401_v17 }
 0x129   : > { %v956_v41 = vcombine.low %v860_v29, %v866_v34  ;;  %v957_v42 = vcombine.low %v872_v30, %v878_v35  ;;  %v890_v43 = vadd.f32 %v889_v36, %v888_v28  ;;  %v838_v44 = vmul.f32 %v820_v2, %v1405_v21 }
 0x12a   : > { %v892_v45 = vadd.f32 %v891_v38, %v835_v32  ;;  %v903_v25 = vrot.slane %v837_v39, 4  ;;  %v897_v46 = vrot.slane %v836_v40, 4  ;;  %v839_v26 = vmul.f32 %v769_v59, %v1399_v16 }
 0x12b   : > { %v963_v47 = vrot.slane %v957_v42, 7  ;;  %v958_v48 = vcombine.low %v884_v37, %v890_v43  ;;  %v909_v5 = vrot.slane %v838_v44, 4  ;;  %v841_v49 = vmul.f32 %v822_v6, %v1403_v18 }
 0x12c   : > { %v893_v8 = vrot.slane %v892_v45, 2  ;;  %v904_v50 = vadd.f32 %v903_v25, %v837_v39  ;;  %v898_v51 = vadd.f32 %v897_v46, %v836_v40  ;;  %v915_v52 = vrot.slane %v839_v26, 4 }
 0x12d   : > { %v965_v53 = vsel %vm964_vm1, %v963_v47, %v955_v33  ;;  %v978_v54 = vrot.slane %v958_v48, 7  ;;  %v910_v55 = vadd.f32 %v909_v5, %v838_v44  ;;  %v927_v19 = vrot.slane %v841_v49, 4 }
 0x12e   : > { %v967_v22 = vsel %vm966_vm2, %v963_v47, %v965_v53  ;;  %v894_v56 = vadd.f32 %v893_v8, %v892_v45  ;;  %v905_v7 = vrot.slane %v904_v50, 2  ;;  %v899_v23 = vrot.slane %v898_v51, 2 }
 0x12f   : > { %v979_v16 = vsel %vm964_vm1, %v978_v54, %v956_v41  ;;  %v911_v24 = vrot.slane %v910_v55, 2  ;;  %v916_v57 = vadd.f32 %v915_v52, %v839_v26  ;;  %v928_v58 = vadd.f32 %v927_v19, %v841_v49 }
 0x130   : > { %v980_v18 = vsel %vm966_vm2, %v978_v54, %v979_v16  ;;  %v895_v59 = vrot.slane %v894_v56, 1  ;;  %v906_v60 = vadd.f32 %v905_v7, %v904_v50  ;;  %v900_v61 = vadd.f32 %v899_v23, %v898_v51 }
 0x131   : > { %v912_v1 = vadd.f32 %v911_v24, %v910_v55  ;;  %v917_v62 = vrot.slane %v916_v57, 2  ;;  %v929_v2 = vrot.slane %v928_v58, 2  ;;  %v840_v0 = vmul.f32 %v1415_v63, %v1401_v17 }
 0x132   : > { %v896_v11 = vadd.f32 %v895_v59, %v894_v56  ;;  %v907_v3 = vrot.slane %v906_v60, 1  ;;  %v901_v4 = vrot.slane %v900_v61, 1  ;;  %v842_v6 = vmul.f32 %v824_v15, %v1405_v21 }
 0x133   : > { %v913_v12 = vrot.slane %v912_v1, 1  ;;  %v918_v9 = vadd.f32 %v917_v62, %v916_v57  ;;  %v921_v10 = vrot.slane %v840_v0, 4  ;;  %v930_v27 = vadd.f32 %v929_v2, %v928_v58 }
 0x134   : > { %v908_v14 = vadd.f32 %v907_v3, %v906_v60  ;;  %v902_v20 = vadd.f32 %v901_v4, %v900_v61  ;;  %v933_v13 = vrot.slane %v842_v6, 4 }
 0x135   : > { %v914_v28 = vadd.f32 %v913_v12, %v912_v1  ;;  %v922_v29 = vadd.f32 %v921_v10, %v840_v0  ;;  %v919_v33 = vrot.slane %v918_v9, 1  ;;  %v931_v34 = vrot.slane %v930_v27, 1 }
 0x136   : > { %v959_v30 = vcombine.low %v896_v11, %v902_v20  ;;  %v934_v31 = vadd.f32 %v933_v13, %v842_v6 }
 0x137   : > { %v960_v32 = vcombine.low %v908_v14, %v914_v28  ;;  %v923_v17 = vrot.slane %v922_v29, 2  ;;  %v920_v40 = vadd.f32 %v919_v33, %v918_v9  ;;  %v932_v43 = vadd.f32 %v931_v34, %v930_v27 }
 0x138   : > { %v968_v63 = vrot.slane %v959_v30, 6  ;;  %v935_v35 = vrot.slane %v934_v31, 2 }
 0x139   : > { %v981_v21 = vrot.slane %v960_v32, 6  ;;  %v924_v15 = vadd.f32 %v923_v17, %v922_v29 }
 0x13a   : > { %v970_v36 = vsel %vm969_vm3, %v968_v63, %v967_v22  ;;  %v936_v37 = vadd.f32 %v935_v35, %v934_v31 }
 0x13b   : > { %v972_v38 = vsel %vm971_vm4, %v968_v63, %v970_v36  ;;  %v982_v39 = vsel %vm969_vm3, %v981_v21, %v980_v18  ;;  %v925_v41 = vrot.slane %v924_v15, 1 }
 0x13c   : > { %v983_v42 = vsel %vm971_vm4, %v981_v21, %v982_v39  ;;  %v937_v44 = vrot.slane %v936_v37, 1 }
 0x13d   : > { %v926_v45 = vadd.f32 %v925_v41, %v924_v15 }
 0x13e   : > { %v938_v25 = vadd.f32 %v937_v44, %v936_v37 }
 0x13f   : > { %v961_v46 = vcombine.low %v920_v40, %v926_v45 }
 0x140   : > { %v962_v26 = vcombine.low %v932_v43, %v938_v25 }
 0x141   : > { %v973_v47 = vrot.slane %v961_v46, 5 }
 0x142   : > { %v984_v48 = vrot.slane %v962_v26, 5 }
 0x143   : > { %v975_v5 = vsel %vm974_vm5, %v973_v47, %v972_v38 }
 0x144   : > { %v977_v49 = vsel %vm976_vm6, %v973_v47, %v975_v5  ;;  %v985_v8 = vsel %vm974_vm5, %v984_v48, %v983_v42 }
 0x145   : > { %989 = vst [vmem:[%s250_s29] sm:$0xff] %v977_v49  ;;  %v986_v50 = vsel %vm976_vm6, %v984_v48, %v985_v8 }
 0x146   : > { %990 = vst [vmem:[%s250_s29 + $0x8] sm:$0xff] %v986_v50 }
 0x147 PF: > { %s13_s14 = sadd.s32 1, %s1178_s14   ;;  %s1447_s12 = smov %s1174_s13 }
 0x148   : > { %p10_p5 = scmp.ge.s32.totalorder %s13_s14, 4   ;;  %s1448_s13 = smov %s1450_s15 }
 0x14a   :  { %12 = sbr.rel (!%p10_p5) target bundleno = 2 (0x2), region = 68 }

</bundles_post_ra>
